<compile_context>
chip_gen: v7x
topology: tpu7x:2x2x1
jax: 0.10.0
libtpu: 0.0.40
codegen_flags: <defaults>
</compile_context>

<pallas_src>
import jax
import jax.numpy as jnp
from jax.experimental import pallas as pl
from jax.experimental.pallas import tpu as pltpu


def _round_up(n, m):
    return ((n + m - 1) // m) * m


# ----------------------------------------------------------------------------- kernel
def pnn_kernel(x_ref, y_ref, we_ref, be_ref, wf_ref, o_ref):
    """One batch tile of the PNN forward pass.

    x_ref, y_ref : (TB, F) f32 activations
    we_ref       : (F, F) bf16 embedding weight, pre-transposed to (in, out)
    be_ref       : (1,  F) f32 embedding bias row
    wf_ref       : (F, F) bf16 fused interaction+product weight (in, out):
                     wf[:, j] = Wi^T[:, j] + Wp^T[:, 0]
                   so one matmul yields interaction_j + product for every j.
    o_ref        : (TB, F) f32 output
    """
    # embedding: bf16 MXU matmul, f32 accumulation; bias add in f32.
    x_emb = jnp.dot(x_ref[...].astype(jnp.bfloat16), we_ref[...],
                    preferred_element_type=jnp.float32)
    x_emb = x_emb + be_ref[...]

    # elementwise product stays f32 on the VPU (v5e has no bf16 VALU).
    xy = x_emb * y_ref[...]

    # interaction + product fused into a single bf16 MXU pass.
    z = jnp.dot(xy.astype(jnp.bfloat16), wf_ref[...],
                preferred_element_type=jnp.float32)
    o_ref[...] = z.astype(o_ref.dtype)


# ------------------------------------------------------------------- parameter prep
def prepare_pnn_params(w_emb, b_emb, w_int, w_prod):
    """One-time parameter prep (at init time, NOT per forward call).

    PyTorch layouts in: w_emb (F,F), b_emb (F,), w_int (F,F), w_prod (1,F).
    Returns pre-transposed (in, out) bf16 weights with the product weight
    folded into the interaction weight, plus the f32 bias row.
    """
    F = w_emb.shape[0]
    we_t = jnp.asarray(w_emb, jnp.float32).T.astype(jnp.bfloat16)        # (F, F)
    be = jnp.asarray(b_emb, jnp.float32).reshape(1, F)                   # (1, F) f32
    # z[:, j] = sum_k xy[:, k] * (Wi[j, k] + Wp[0, k]) = interaction_j + product
    wf = (jnp.asarray(w_int, jnp.float32).T
          + jnp.asarray(w_prod, jnp.float32).T).astype(jnp.bfloat16)     # (F, F)
    return we_t, be, wf, F


# --------------------------------------------------------------------- tile planning
_ACT_VMEM_BUDGET = 24 << 20  # activation-stream budget; keeps plan safe on v7x 64 MiB


def _pick_batch_tile(B, F, batch_tile):
    # Largest tile whose 3 double-buffered f32 activation streams (x, y, out)
    # fit the budget.
    cap = max(8, (_ACT_VMEM_BUDGET // (3 * 2 * F * 4)) // 8 * 8)
    tb_max = min(batch_tile, cap)
    if B <= tb_max:
        return B  # single full-batch block (block dim == full array dim is legal)
    # Multiple of 8 sublanes (unmasked stores) and >= 4 grid steps so the
    # "parallel" batch axis actually shards across v7x's two TensorCores.
    tb = min(tb_max, _round_up(pl.cdiv(B, 4), 8))
    return max(8, (tb // 8) * 8)


def _build_pnn_call(B, F, tb, out_dtype, single_buffer_weights):
    grid = (pl.cdiv(B, tb),)
    act_spec = pl.BlockSpec((tb, F), lambda i: (i, 0))

    def resident(shape):
        # Block index never changes -> stays VMEM-resident across batch tiles.
        # Single-buffering halves its footprint (double-buffering a constant
        # block buys nothing).
        if single_buffer_weights:
            return pl.BlockSpec(shape, lambda i: (0,) * len(shape),
                                pipeline_mode=pl.Buffered(1))
        return pl.BlockSpec(shape, lambda i: (0,) * len(shape))

    w_bufs = 1 if single_buffer_weights else 2
    needed = (3 * 2 * tb * F * 4                     # x, y, out double-buffered f32
              + w_bufs * (2 * F * F * 2 + F * 4))    # bf16 weights + f32 bias
    # Explicit scoped-VMEM limit from the tile plan (defaults are 16/32 MiB);
    # clamp so we never ask for more than is sensible on any generation.
    vmem_limit = int(min(max(needed * 1.25 + (4 << 20), 32 << 20), 96 << 20))

    cost = pl.CostEstimate(
        flops=2 * 2 * B * F * F + B * F,             # two matmuls + elementwise
        transcendentals=0,
        bytes_accessed=3 * B * F * 4 + 2 * F * F * 2 + F * 4,
    )

    return pl.pallas_call(
        pnn_kernel,
        out_shape=jax.ShapeDtypeStruct((B, F), out_dtype),
        grid=grid,
        in_specs=[act_spec, act_spec, resident((F, F)), resident((1, F)),
                  resident((F, F))],
        out_specs=act_spec,
        compiler_params=pltpu.CompilerParams(
            dimension_semantics=("parallel",),
            vmem_limit_bytes=vmem_limit,
        ),
        cost_estimate=cost,
    )


# -------------------------------------------------------------------------- forward
def pnn_forward_prepared(x, y, params, *, batch_tile=1024):
    """Forward pass with already-prepared (transposed / fused / bf16) params."""
    we_t, be, wf, F = params
    B = x.shape[0]
    tb = _pick_batch_tile(B, F, batch_tile)

    single = hasattr(pl, "Buffered")
    try:
        call = _build_pnn_call(B, F, tb, x.dtype, single_buffer_weights=single)
        return call(x, y, we_t, be, wf)
    except Exception:
        if not single:
            raise
        # Fallback for JAX versions where pipeline_mode / Buffered is not
        # supported on the auto-pipelined pallas_call path.
        call = _build_pnn_call(B, F, tb, x.dtype, single_buffer_weights=False)
        return call(x, y, we_t, be, wf)


def pnn_forward(x, y, w_emb, b_emb, w_int, w_prod):
    """Convenience wrapper taking PyTorch-layout parameters directly."""
    params = prepare_pnn_params(w_emb, b_emb, w_int, w_prod)
    return pnn_forward_prepared(x, y, params)


# ------------------------------------------------------------------------ references
def pnn_reference_f32(x, y, w_emb, b_emb, w_int, w_prod):
    """Exact PyTorch-module semantics in f32."""
    x_emb = x @ w_emb.T + b_emb
    xy = x_emb * y
    return xy @ w_int.T + xy @ w_prod.T            # (B,F) + (B,1) broadcast


def pnn_reference_bf16(x, y, w_emb, b_emb, w_int, w_prod):
    """Same math with the kernel's bf16-operand / f32-accumulate numerics."""
    bf = jnp.bfloat16
    we_t = jnp.asarray(w_emb, jnp.float32).T.astype(bf)
    wf = (jnp.asarray(w_int, jnp.float32).T
          + jnp.asarray(w_prod, jnp.float32).T).astype(bf)
    x_emb = jnp.dot(x.astype(bf), we_t, preferred_element_type=jnp.float32) + b_emb
    xy = x_emb * y
    return jnp.dot(xy.astype(bf), wf, preferred_element_type=jnp.float32)


if __name__ == "__main__":
    B, F = 8, 32  # small batch / feature_size consistent with the module

    key = jax.random.PRNGKey(0)
    kx, ky, k1, k2, k3, k4 = jax.random.split(key, 6)

    x = jax.random.normal(kx, (B, F), dtype=jnp.float32)
    y = jax.random.normal(ky, (B, F), dtype=jnp.float32)

    # deterministic params mimicking PyTorch Linear default init (uniform +/- 1/sqrt(in))
    bound = 1.0 / (F ** 0.5)
    w_emb = jax.random.uniform(k1, (F, F), jnp.float32, -bound, bound)   # embedding.weight (out, in)
    b_emb = jax.random.uniform(k2, (F,), jnp.float32, -bound, bound)     # embedding.bias
    w_int = jax.random.uniform(k3, (F, F), jnp.float32, -bound, bound)   # interaction.weight
    w_prod = jax.random.uniform(k4, (1, F), jnp.float32, -bound, bound)  # product.weight

    # one-time parameter prep, then the hot-path forward
    params = prepare_pnn_params(w_emb, b_emb, w_int, w_prod)
    out = pnn_forward_prepared(x, y, params)
    out = jax.block_until_ready(out)
    assert out.shape == (B, F)

    # Tight check: kernel vs a JAX reference with matching bf16 numerics.
    ref_bf16 = pnn_reference_bf16(x, y, w_emb, b_emb, w_int, w_prod)
    assert jnp.allclose(out, ref_bf16, atol=5e-3, rtol=5e-3), \
        "mismatch vs bf16-matched reference"

    # Sanity check: kernel vs the exact f32 PyTorch-module semantics
    # (looser tolerance because matmul operands are bf16 in the kernel).
    ref_f32 = pnn_reference_f32(x, y, w_emb, b_emb, w_int, w_prod)
    assert jnp.allclose(out, ref_f32, atol=1e-1, rtol=1e-1), \
        "mismatch vs f32 reference"

    print("KERNEL_OK")
</pallas_src>

<mosaic_0001>
module attributes {stable_mosaic.version = 11 : i64} {
  func.func @pnn_kernel(%arg0: i32, %arg1: memref<8x32xf32, #tpu.memory_space<vmem>>, %arg2: memref<8x32xf32, #tpu.memory_space<vmem>>, %arg3: memref<32x32xbf16, #tpu.memory_space<vmem>>, %arg4: memref<1x32xf32, #tpu.memory_space<vmem>>, %arg5: memref<32x32xbf16, #tpu.memory_space<vmem>>, %arg6: memref<8x32xf32, #tpu.memory_space<vmem>>) attributes {dimension_semantics = [#tpu.dimension_semantics<parallel>], iteration_bounds = array<i64: 1>, scalar_prefetch = 0 : i64, scratch_operands = 0 : i64, tpu.core_type = #tpu.core_type<tc>, window_params = [{transform_indices = @transform_0, window_bounds = array<i64: 8, 32>}, {transform_indices = @transform_1, window_bounds = array<i64: 8, 32>}, {pipeline_mode = #tpu.pipeline_mode<synchronous>, transform_indices = @transform_2, window_bounds = array<i64: 32, 32>}, {pipeline_mode = #tpu.pipeline_mode<synchronous>, transform_indices = @transform_3, window_bounds = array<i64: 1, 32>}, {pipeline_mode = #tpu.pipeline_mode<synchronous>, transform_indices = @transform_4, window_bounds = array<i64: 32, 32>}, {transform_indices = @transform_5, window_bounds = array<i64: 8, 32>}]} {
    %c0 = arith.constant 0 : index
    %c0_0 = arith.constant 0 : index
    %0 = vector.load %arg1[%c0, %c0_0] : memref<8x32xf32, #tpu.memory_space<vmem>>, vector<8x32xf32>
    %1 = arith.truncf %0 : vector<8x32xf32> to vector<8x32xbf16>
    %c0_1 = arith.constant 0 : index
    %c0_2 = arith.constant 0 : index
    %2 = vector.load %arg3[%c0_1, %c0_2] : memref<32x32xbf16, #tpu.memory_space<vmem>>, vector<32x32xbf16>
    %cst = arith.constant dense<0.000000e+00> : vector<8x32xf32>
    %3 = tpu.matmul %1, %2, %cst {dimension_numbers = #tpu.dot_dimension_numbers<[1], [0], [0], [1], [0, 0, 1, 1], [], []>} : vector<8x32xbf16>, vector<32x32xbf16>, vector<8x32xf32> -> vector<8x32xf32>
    %c0_3 = arith.constant 0 : index
    %c0_4 = arith.constant 0 : index
    %4 = vector.load %arg4[%c0_3, %c0_4] : memref<1x32xf32, #tpu.memory_space<vmem>>, vector<1x32xf32>
    %5 = vector.broadcast %4 : vector<1x32xf32> to vector<8x32xf32>
    %6 = arith.addf %3, %5 : vector<8x32xf32>
    %c0_5 = arith.constant 0 : index
    %c0_6 = arith.constant 0 : index
    %7 = vector.load %arg2[%c0_5, %c0_6] : memref<8x32xf32, #tpu.memory_space<vmem>>, vector<8x32xf32>
    %8 = arith.mulf %6, %7 : vector<8x32xf32>
    %9 = arith.truncf %8 : vector<8x32xf32> to vector<8x32xbf16>
    %c0_7 = arith.constant 0 : index
    %c0_8 = arith.constant 0 : index
    %10 = vector.load %arg5[%c0_7, %c0_8] : memref<32x32xbf16, #tpu.memory_space<vmem>>, vector<32x32xbf16>
    %cst_9 = arith.constant dense<0.000000e+00> : vector<8x32xf32>
    %11 = tpu.matmul %9, %10, %cst_9 {dimension_numbers = #tpu.dot_dimension_numbers<[1], [0], [0], [1], [0, 0, 1, 1], [], []>} : vector<8x32xbf16>, vector<32x32xbf16>, vector<8x32xf32> -> vector<8x32xf32>
    %c0_10 = arith.constant 0 : index
    %c0_11 = arith.constant 0 : index
    %12 = vector.load %arg6[%c0_10, %c0_11] : memref<8x32xf32, #tpu.memory_space<vmem>>, vector<8x32xf32>
    tpu.vector_store %arg6[%c0_10, %c0_11], %11 {strides = array<i32>} : memref<8x32xf32, #tpu.memory_space<vmem>>, vector<8x32xf32>,
    return
  }
  func.func @transform_0(%arg0: i32) -> (i32, i32) {
    %c0_i32 = arith.constant 0 : i32
    %c0_i32_0 = arith.constant 0 : i32
    return %arg0, %c0_i32 : i32, i32
  }
  func.func @transform_1(%arg0: i32) -> (i32, i32) {
    %c0_i32 = arith.constant 0 : i32
    %c0_i32_0 = arith.constant 0 : i32
    return %arg0, %c0_i32 : i32, i32
  }
  func.func @transform_2(%arg0: i32) -> (i32, i32) {
    %c0_i32 = arith.constant 0 : i32
    %c0_i32_0 = arith.constant 0 : i32
    %c0_i32_1 = arith.constant 0 : i32
    return %c0_i32, %c0_i32_0 : i32, i32
  }
  func.func @transform_3(%arg0: i32) -> (i32, i32) {
    %c0_i32 = arith.constant 0 : i32
    %c0_i32_0 = arith.constant 0 : i32
    %c0_i32_1 = arith.constant 0 : i32
    return %c0_i32, %c0_i32_0 : i32, i32
  }
  func.func @transform_4(%arg0: i32) -> (i32, i32) {
    %c0_i32 = arith.constant 0 : i32
    %c0_i32_0 = arith.constant 0 : i32
    %c0_i32_1 = arith.constant 0 : i32
    return %c0_i32, %c0_i32_0 : i32, i32
  }
  func.func @transform_5(%arg0: i32) -> (i32, i32) {
    %c0_i32 = arith.constant 0 : i32
    %c0_i32_0 = arith.constant 0 : i32
    return %arg0, %c0_i32 : i32, i32
  }
}

module attributes {stable_mosaic.version = 11 : i64} {
  func.func @pnn_kernel(%arg0: i32, %arg1: memref<8x32xf32, #tpu.memory_space<vmem>>, %arg2: memref<8x32xf32, #tpu.memory_space<vmem>>, %arg3: memref<32x32xbf16, #tpu.memory_space<vmem>>, %arg4: memref<1x32xf32, #tpu.memory_space<vmem>>, %arg5: memref<32x32xbf16, #tpu.memory_space<vmem>>, %arg6: memref<8x32xf32, #tpu.memory_space<vmem>>) attributes {dimension_semantics = [#tpu.dimension_semantics<parallel>], iteration_bounds = array<i64: 1>, scalar_prefetch = 0 : i64, scratch_operands = 0 : i64, tpu.core_type = #tpu.core_type<tc>, window_params = [{transform_indices = @transform_0, window_bounds = array<i64: 8, 32>}, {transform_indices = @transform_1, window_bounds = array<i64: 8, 32>}, {pipeline_mode = #tpu.pipeline_mode<synchronous>, transform_indices = @transform_2, window_bounds = array<i64: 32, 32>}, {pipeline_mode = #tpu.pipeline_mode<synchronous>, transform_indices = @transform_3, window_bounds = array<i64: 1, 32>}, {pipeline_mode = #tpu.pipeline_mode<synchronous>, transform_indices = @transform_4, window_bounds = array<i64: 32, 32>}, {transform_indices = @transform_5, window_bounds = array<i64: 8, 32>}]} {
    %c0 = arith.constant 0 : index
    %c0_0 = arith.constant 0 : index
    %0 = vector.load %arg1[%c0, %c0_0] : memref<8x32xf32, #tpu.memory_space<vmem>>, vector<8x32xf32>
    %1 = arith.truncf %0 : vector<8x32xf32> to vector<8x32xbf16>
    %c0_1 = arith.constant 0 : index
    %c0_2 = arith.constant 0 : index
    %2 = vector.load %arg3[%c0_1, %c0_2] : memref<32x32xbf16, #tpu.memory_space<vmem>>, vector<32x32xbf16>
    %cst = arith.constant dense<0.000000e+00> : vector<8x32xf32>
    %3 = tpu.matmul %1, %2, %cst {dimension_numbers = #tpu.dot_dimension_numbers<[1], [0], [0], [1], [0, 0, 1, 1], [], []>} : vector<8x32xbf16>, vector<32x32xbf16>, vector<8x32xf32> -> vector<8x32xf32>
    %c0_3 = arith.constant 0 : index
    %c0_4 = arith.constant 0 : index
    %4 = vector.load %arg4[%c0_3, %c0_4] : memref<1x32xf32, #tpu.memory_space<vmem>>, vector<1x32xf32>
    %5 = vector.broadcast %4 : vector<1x32xf32> to vector<8x32xf32>
    %6 = arith.addf %3, %5 : vector<8x32xf32>
    %c0_5 = arith.constant 0 : index
    %c0_6 = arith.constant 0 : index
    %7 = vector.load %arg2[%c0_5, %c0_6] : memref<8x32xf32, #tpu.memory_space<vmem>>, vector<8x32xf32>
    %8 = arith.mulf %6, %7 : vector<8x32xf32>
    %9 = arith.truncf %8 : vector<8x32xf32> to vector<8x32xbf16>
    %c0_7 = arith.constant 0 : index
    %c0_8 = arith.constant 0 : index
    %10 = vector.load %arg5[%c0_7, %c0_8] : memref<32x32xbf16, #tpu.memory_space<vmem>>, vector<32x32xbf16>
    %cst_9 = arith.constant dense<0.000000e+00> : vector<8x32xf32>
    %11 = tpu.matmul %9, %10, %cst_9 {dimension_numbers = #tpu.dot_dimension_numbers<[1], [0], [0], [1], [0, 0, 1, 1], [], []>} : vector<8x32xbf16>, vector<32x32xbf16>, vector<8x32xf32> -> vector<8x32xf32>
    %c0_10 = arith.constant 0 : index
    %c0_11 = arith.constant 0 : index
    %12 = vector.load %arg6[%c0_10, %c0_11] : memref<8x32xf32, #tpu.memory_space<vmem>>, vector<8x32xf32>
    tpu.vector_store %arg6[%c0_10, %c0_11], %11 {strides = array<i32>} : memref<8x32xf32, #tpu.memory_space<vmem>>, vector<8x32xf32>,
    return
  }
  func.func @transform_0(%arg0: i32) -> (i32, i32) {
    %c0_i32 = arith.constant 0 : i32
    %c0_i32_0 = arith.constant 0 : i32
    return %arg0, %c0_i32 : i32, i32
  }
  func.func @transform_1(%arg0: i32) -> (i32, i32) {
    %c0_i32 = arith.constant 0 : i32
    %c0_i32_0 = arith.constant 0 : i32
    return %arg0, %c0_i32 : i32, i32
  }
  func.func @transform_2(%arg0: i32) -> (i32, i32) {
    %c0_i32 = arith.constant 0 : i32
    %c0_i32_0 = arith.constant 0 : i32
    %c0_i32_1 = arith.constant 0 : i32
    return %c0_i32, %c0_i32_0 : i32, i32
  }
  func.func @transform_3(%arg0: i32) -> (i32, i32) {
    %c0_i32 = arith.constant 0 : i32
    %c0_i32_0 = arith.constant 0 : i32
    %c0_i32_1 = arith.constant 0 : i32
    return %c0_i32, %c0_i32_0 : i32, i32
  }
  func.func @transform_4(%arg0: i32) -> (i32, i32) {
    %c0_i32 = arith.constant 0 : i32
    %c0_i32_0 = arith.constant 0 : i32
    %c0_i32_1 = arith.constant 0 : i32
    return %c0_i32, %c0_i32_0 : i32, i32
  }
  func.func @transform_5(%arg0: i32) -> (i32, i32) {
    %c0_i32 = arith.constant 0 : i32
    %c0_i32_0 = arith.constant 0 : i32
    return %arg0, %c0_i32 : i32, i32
  }
}

</mosaic_0001>

<bundles_post_ra>
// kernel: tpu_custom_call.1
= control target key start
LH: loop header
LB: loop body
LE: loop exit
PB: predicated region body
PF: predicated region fallthrough
CT: control target
= control target key end

     0   :  { %10 = vsyncpa [#allocation3], 0  ;;  %s487_s0 = inlined_call_operand.hbm [shape: f32[8,32], index: 0, kind: input, shape index: {}]   ;;  %s488_s1 = inlined_call_operand.hbm [shape: f32[8,32], index: 1, kind: input, shape index: {}]   ;;  %s489_s2 = inlined_call_operand.hbm [shape: bf16[32,32], index: 2, kind: input, shape index: {}]   ;;  %s490_s3 = inlined_call_operand.vmem [shape: f32[1,32], index: 3, kind: input, shape index: {}]   ;;  %s491_s4 = inlined_call_operand.hbm [shape: bf16[32,32], index: 4, kind: input, shape index: {}]   ;;  %s492_s5 = inlined_call_operand.hbm [shape: f32[8,32], index: 5, kind: output, shape index: {}]  }
   0x1   :  { %11 = vsyncpa [#allocation6], 0 }
   0x2   :  { %12 = vsyncpa [#allocation9], 0 }
   0x3   :  { %13 = vsyncpa [#allocation4], 0  ;;  %s382_s18 = smov [#allocation5]   ;;  %s383_s20 = smov [#allocation2]  }
   0x4   :  { %s30_s19 = sshll.u32 %s382_s18, 4  ;;  %s20_s21 = sshll.u32 %s383_s20, 4  ;;  %s31_s19 = int_to_ptr.vmem [resolvable:$true] %s30_s19  ;;  %s21_s21 = int_to_ptr.vmem [resolvable:$true] %s20_s21 }
   0x5   :  { %s264_s24 = scalar_lea.hbm %s488_s1, 128 }
   0x6   :  { %p265_p0 = scmp.ne.s32.totalorder %s488_s1, %s264_s24  ;;  %p268_p1 = scmp.lt.u32.totalorder %s264_s24, %s488_s1 }
   0x8   :  { %p270_p2 = pnand %p268_p1, %p265_p0 }
   0xa   :  { %273 = shalt.err (!%p270_p2)
}
   0xb   :  { %s274_s29 = scalar_lea.vmem %s31_s19, 128  ;;  %p279_p4 = scmp.lt.s32.totalorder %s31_s19, %s31_s19 }
   0xc   :  { %p275_p3 = scmp.ne.s32.totalorder %s31_s19, %s274_s29  ;;  %p280_p5 = scmp.lt.s32.totalorder %s274_s29, %s274_s29 }
   0xe   :  { %p281_p6 = por %p280_p5, %p279_p4 }
  0x10   :  { %p282_p7 = pnand %p281_p6, %p275_p3 }
  0x12   :  { %285 = shalt.err (!%p282_p7)
}
  0x13   :  { %33 = dma.hbm_to_vmem [thread:$0]  %s488_s1, 128, %s31_s19, [#allocation6]  }
  0x14   :  { %s286_s9 = scalar_lea.hbm %s487_s0, 128 }
  0x15   :  { %p287_p8 = scmp.ne.s32.totalorder %s487_s0, %s286_s9  ;;  %p290_p9 = scmp.lt.u32.totalorder %s286_s9, %s487_s0 }
  0x17   :  { %p292_p10 = pnand %p290_p9, %p287_p8 }
  0x19   :  { %295 = shalt.err (!%p292_p10)
}
  0x1a   :  { %s296_s14 = scalar_lea.vmem %s21_s21, 128  ;;  %p301_p12 = scmp.lt.s32.totalorder %s21_s21, %s21_s21 }
  0x1b   :  { %p297_p11 = scmp.ne.s32.totalorder %s21_s21, %s296_s14  ;;  %p302_p13 = scmp.lt.s32.totalorder %s296_s14, %s296_s14 }
  0x1d   :  { %p303_p0 = por %p302_p13, %p301_p12 }
  0x1f   :  { %p304_p1 = pnand %p303_p0, %p297_p11 }
  0x21   :  { %307 = shalt.err (!%p304_p1)
}
  0x22   :  { %23 = dma.hbm_to_vmem [thread:$0]  %s487_s0, 128, %s21_s21, [#allocation3]  }
  0x23   :  { %s384_s16 = smov [#allocation7]   ;;  %s308_s20 = scalar_lea.hbm %s489_s2, 256 }
  0x24   :  { %s39_s17 = sshll.u32 %s384_s16, 4  ;;  %p309_p2 = scmp.ne.s32.totalorder %s489_s2, %s308_s20  ;;  %s40_s17 = int_to_ptr.vmem [resolvable:$true] %s39_s17 }
  0x25   :  { %p312_p3 = scmp.lt.u32.totalorder %s308_s20, %s489_s2 }
  0x27   :  { %p314_p4 = pnand %p312_p3, %p309_p2 }
  0x29   :  { %317 = shalt.err (!%p314_p4)
}
  0x2a   :  { %s318_s26 = scalar_lea.vmem %s40_s17, 256  ;;  %p323_p6 = scmp.lt.s32.totalorder %s40_s17, %s40_s17 }
  0x2b   :  { %p319_p5 = scmp.ne.s32.totalorder %s40_s17, %s318_s26  ;;  %p324_p7 = scmp.lt.s32.totalorder %s318_s26, %s318_s26 }
  0x2d   :  { %p325_p8 = por %p324_p7, %p323_p6 }
  0x2f   :  { %p326_p9 = pnand %p325_p8, %p319_p5 }
  0x31   :  { %329 = shalt.err (!%p326_p9)
}
  0x32   :  { %s385_s0 = smov 64   ;;  %s386_s21 = smov 4  }
  0x33   :  { %45 = dma.hbm_to_vmem [thread:$0]  %s489_s2, 256, %s40_s17, [#allocation6], %s385_s0, %s385_s0, %s386_s21  }
  0x34   :  { %s387_s29 = smov [#allocation8]   ;;  %s330_s8 = scalar_lea.hbm %s491_s4, 256 }
  0x35   :  { %s53_s30 = sshll.u32 %s387_s29, 4  ;;  %p331_p10 = scmp.ne.s32.totalorder %s491_s4, %s330_s8  ;;  %s54_s30 = int_to_ptr.vmem [resolvable:$true] %s53_s30 }
  0x36   :  { %p334_p11 = scmp.lt.u32.totalorder %s330_s8, %s491_s4 }
  0x38   :  { %p336_p12 = pnand %p334_p11, %p331_p10 }
  0x3a   :  { %339 = shalt.err (!%p336_p12)
}
  0x3b   :  { %s340_s13 = scalar_lea.vmem %s54_s30, 256  ;;  %p345_p0 = scmp.lt.s32.totalorder %s54_s30, %s54_s30 }
  0x3c   :  { %p341_p13 = scmp.ne.s32.totalorder %s54_s30, %s340_s13  ;;  %p346_p1 = scmp.lt.s32.totalorder %s340_s13, %s340_s13 }
  0x3e   :  { %p347_p2 = por %p346_p1, %p345_p0 }
  0x40   :  { %p348_p3 = pnand %p347_p2, %p341_p13 }
  0x42   :  { %351 = shalt.err (!%p348_p3)
}
  0x43   :  { %59 = dma.hbm_to_vmem [thread:$0]  %s491_s4, 256, %s54_s30, [#allocation9], %s385_s0, %s385_s0, %s386_s21  }
  0x44   :  { %374 = dma.done.wait [#allocation3], 128  }
  0x45   :  { %375 = vsyncadd [#allocation3], 4294967168 }
  0x46   :  { %376 = dma.done.wait [#allocation6], 384  }
  0x47   :  { %377 = vsyncadd [#allocation6], 4294966912 }
  0x48   :  { %378 = dma.done.wait [#allocation9], 256  }
  0x49   :  { %379 = vsyncadd [#allocation9], 4294967040  ;;  %v388_v0 = vmov 0.0   ;;  %vm389_vm0 = vmmov 0   ;;  %v260_v1 = vld [vmem:[#allocation7] sm:$0xff]   ;;  %v261_v2 = vld [vmem:[#allocation7 + $0x8] sm:$0xff]  }
  0x4a   :  { %235 = vmatprep.subr.bf16.mxu0 %v388_v0  ;;  %239 = vmatprep.mubr.msk.bf16.mxu0 %vm389_vm0, %v388_v0  ;;  %v73_v3 = vld [vmem:[#allocation2] sm:$0xff]  ;;  %vm98_vm1 = vcmask 261120   ;;  %v263_v6 = vld [vmem:[#allocation8 + $0x8] sm:$0xff]   ;;  %s390_s15 = smov [#allocation10]  }
  0x4b   :  { %243 = vmatprep.subr.bf16.mxu1 %v388_v0  ;;  %247 = vmatprep.mubr.msk.bf16.mxu1 %vm389_vm0, %v388_v0  ;;  %v74_v4 = vpack.c.bf16 %v73_v3, %v73_v3  ;;  %v262_v5 = vld [vmem:[#allocation8] sm:$0xff]   ;;  %v142_v9 = vld [vmem:[#allocation5] sm:$0xff]  ;;  %s211_s16 = sshll.u32 %s390_s15, 4  ;;  %s212_s16 = int_to_ptr.vmem [resolvable:$true] %s211_s16 }
  0x4c   :  { %236 = vmatpush3.bf16.msra.mxu0 %v260_v1  ;;  %244 = vmatpush3.bf16.msra.mxu1 %v262_v5  ;;  %v222_v7 = vld [vmem:[%s490_s3] ss:$0 sm:$0xff]  ;;  %s352_s17 = scalar_lea.vmem %s212_s16, 128  ;;  %p357_p5 = scmp.lt.s32.totalorder %s212_s16, %s212_s16 }
  0x4d   :  { %237 = vmatprep.subr.bf16.mxu0 %v388_v0  ;;  %245 = vmatprep.subr.bf16.mxu1 %v388_v0  ;;  %p353_p4 = scmp.ne.s32.totalorder %s212_s16, %s352_s17  ;;  %p358_p6 = scmp.lt.s32.totalorder %s352_s17, %s352_s17 }
  0x4f   :  { %p359_p7 = por %p358_p6, %p357_p5 }
  0x50   :  { %238 = vmatpush3.bf16.msra.mxu0 %v261_v2  ;;  %246 = vmatpush3.bf16.msra.mxu1 %v263_v6 }
  0x51   :  { %p360_p8 = pnand %p359_p7, %p353_p4 }
  0x53   :  { %240 = vmatmul.mubr.msk.bf16.vlgmr.msra.gmra.mrb[0].mxu0 %vm98_vm1, %v74_v4 }
 0x126   :  { %v136_v8 = vpop.f32.mrb[0].mxu0 }
 0x127   :  { %v137_v10 = vadd.f32 %v222_v7, %v136_v8  ;;  %v241_v11 = vpop.f32.mrb[1].mxu0 }
 0x128   :  { %v139_v12 = vpop.f32.mrb[2].mxu0 }
 0x129   :  { %v143_v13 = vmul.f32 %v142_v9, %v137_v10  ;;  %v242_v14 = vpop.f32.mrb[3].mxu0 }
 0x12b   :  { %v144_v15 = vpack.c.bf16 %v143_v13, %v143_v13 }
 0x12d   :  { %248 = vmatmul.mubr.msk.bf16.vlgmr.msra.gmra.mrb[0].mxu1 %vm98_vm1, %v144_v15 }
 0x200   :  { %v198_v16 = vpop.f32.mrb[0].mxu1 }
 0x201   :  { %204 = vst.msk [vmem:[#allocation10] sm:$0xff] %vm98_vm1, %v198_v16  ;;  %v249_v17 = vpop.f32.mrb[1].mxu1 }
 0x202   :  { %v201_v18 = vpop.f32.mrb[2].mxu1 }
 0x203   :  { %363 = shalt.err (!%p360_p8)
}
 0x204   :  { %s364_s19 = scalar_lea.hbm %s492_s5, 128 }
 0x205   :  { %p365_p9 = scmp.ne.s32.totalorder %s492_s5, %s364_s19  ;;  %p368_p10 = scmp.lt.u32.totalorder %s364_s19, %s492_s5 }
 0x207   :  { %p370_p11 = pnand %p368_p10, %p365_p9 }
 0x209   :  { %373 = shalt.err (!%p370_p11)
}
 0x20a   :  { %214 = dma.vmem_to_hbm [thread:$0]  %s212_s16, 128, %s492_s5, [#allocation4]   ;;  %v250_v19 = vpop.f32.mrb[3].mxu1 }
 0x20b   :  { %380 = dma.done.wait [#allocation4], 128  }
 0x20c   :  { %381 = vsyncadd [#allocation4], 4294967168 }
 0x20d   :  { %218 = vsyncpa [#allocation3], 1 }
 0x20e   :  { %219 = vsyncpa [#allocation6], 1 }
 0x20f   :  { %220 = vsyncpa [#allocation9], 1 }
 0x210   :  { %221 = vsyncpa [#allocation4], 1 }

// kernel: tpu_custom_call.1
= control target key start
LH: loop header
LB: loop body
LE: loop exit
PB: predicated region body
PF: predicated region fallthrough
CT: control target
= control target key end

     0   :  { %10 = vsyncpa [#allocation3], 0  ;;  %s487_s0 = inlined_call_operand.hbm [shape: f32[8,32], index: 0, kind: input, shape index: {}]   ;;  %s488_s1 = inlined_call_operand.hbm [shape: f32[8,32], index: 1, kind: input, shape index: {}]   ;;  %s489_s2 = inlined_call_operand.hbm [shape: bf16[32,32], index: 2, kind: input, shape index: {}]   ;;  %s490_s3 = inlined_call_operand.vmem [shape: f32[1,32], index: 3, kind: input, shape index: {}]   ;;  %s491_s4 = inlined_call_operand.hbm [shape: bf16[32,32], index: 4, kind: input, shape index: {}]   ;;  %s492_s5 = inlined_call_operand.hbm [shape: f32[8,32], index: 5, kind: output, shape index: {}]  }
   0x1   :  { %11 = vsyncpa [#allocation6], 0 }
   0x2   :  { %12 = vsyncpa [#allocation9], 0 }
   0x3   :  { %13 = vsyncpa [#allocation4], 0  ;;  %s382_s18 = smov [#allocation5]   ;;  %s383_s20 = smov [#allocation2]  }
   0x4   :  { %s30_s19 = sshll.u32 %s382_s18, 4  ;;  %s20_s21 = sshll.u32 %s383_s20, 4  ;;  %s31_s19 = int_to_ptr.vmem [resolvable:$true] %s30_s19  ;;  %s21_s21 = int_to_ptr.vmem [resolvable:$true] %s20_s21 }
   0x5   :  { %s264_s24 = scalar_lea.hbm %s488_s1, 128 }
   0x6   :  { %p265_p0 = scmp.ne.s32.totalorder %s488_s1, %s264_s24  ;;  %p268_p1 = scmp.lt.u32.totalorder %s264_s24, %s488_s1 }
   0x8   :  { %p270_p2 = pnand %p268_p1, %p265_p0 }
   0xa   :  { %273 = shalt.err (!%p270_p2)
}
   0xb   :  { %s274_s29 = scalar_lea.vmem %s31_s19, 128  ;;  %p279_p4 = scmp.lt.s32.totalorder %s31_s19, %s31_s19 }
   0xc   :  { %p275_p3 = scmp.ne.s32.totalorder %s31_s19, %s274_s29  ;;  %p280_p5 = scmp.lt.s32.totalorder %s274_s29, %s274_s29 }
   0xe   :  { %p281_p6 = por %p280_p5, %p279_p4 }
  0x10   :  { %p282_p7 = pnand %p281_p6, %p275_p3 }
  0x12   :  { %285 = shalt.err (!%p282_p7)
}
  0x13   :  { %33 = dma.hbm_to_vmem [thread:$0]  %s488_s1, 128, %s31_s19, [#allocation6]  }
  0x14   :  { %s286_s9 = scalar_lea.hbm %s487_s0, 128 }
  0x15   :  { %p287_p8 = scmp.ne.s32.totalorder %s487_s0, %s286_s9  ;;  %p290_p9 = scmp.lt.u32.totalorder %s286_s9, %s487_s0 }
  0x17   :  { %p292_p10 = pnand %p290_p9, %p287_p8 }
  0x19   :  { %295 = shalt.err (!%p292_p10)
}
  0x1a   :  { %s296_s14 = scalar_lea.vmem %s21_s21, 128  ;;  %p301_p12 = scmp.lt.s32.totalorder %s21_s21, %s21_s21 }
  0x1b   :  { %p297_p11 = scmp.ne.s32.totalorder %s21_s21, %s296_s14  ;;  %p302_p13 = scmp.lt.s32.totalorder %s296_s14, %s296_s14 }
  0x1d   :  { %p303_p0 = por %p302_p13, %p301_p12 }
  0x1f   :  { %p304_p1 = pnand %p303_p0, %p297_p11 }
  0x21   :  { %307 = shalt.err (!%p304_p1)
}
  0x22   :  { %23 = dma.hbm_to_vmem [thread:$0]  %s487_s0, 128, %s21_s21, [#allocation3]  }
  0x23   :  { %s384_s16 = smov [#allocation7]   ;;  %s308_s20 = scalar_lea.hbm %s489_s2, 256 }
  0x24   :  { %s39_s17 = sshll.u32 %s384_s16, 4  ;;  %p309_p2 = scmp.ne.s32.totalorder %s489_s2, %s308_s20  ;;  %s40_s17 = int_to_ptr.vmem [resolvable:$true] %s39_s17 }
  0x25   :  { %p312_p3 = scmp.lt.u32.totalorder %s308_s20, %s489_s2 }
  0x27   :  { %p314_p4 = pnand %p312_p3, %p309_p2 }
  0x29   :  { %317 = shalt.err (!%p314_p4)
}
  0x2a   :  { %s318_s26 = scalar_lea.vmem %s40_s17, 256  ;;  %p323_p6 = scmp.lt.s32.totalorder %s40_s17, %s40_s17 }
  0x2b   :  { %p319_p5 = scmp.ne.s32.totalorder %s40_s17, %s318_s26  ;;  %p324_p7 = scmp.lt.s32.totalorder %s318_s26, %s318_s26 }
  0x2d   :  { %p325_p8 = por %p324_p7, %p323_p6 }
  0x2f   :  { %p326_p9 = pnand %p325_p8, %p319_p5 }
  0x31   :  { %329 = shalt.err (!%p326_p9)
}
  0x32   :  { %s385_s0 = smov 64   ;;  %s386_s21 = smov 4  }
  0x33   :  { %45 = dma.hbm_to_vmem [thread:$0]  %s489_s2, 256, %s40_s17, [#allocation6], %s385_s0, %s385_s0, %s386_s21  }
  0x34   :  { %s387_s29 = smov [#allocation8]   ;;  %s330_s8 = scalar_lea.hbm %s491_s4, 256 }
  0x35   :  { %s53_s30 = sshll.u32 %s387_s29, 4  ;;  %p331_p10 = scmp.ne.s32.totalorder %s491_s4, %s330_s8  ;;  %s54_s30 = int_to_ptr.vmem [resolvable:$true] %s53_s30 }
  0x36   :  { %p334_p11 = scmp.lt.u32.totalorder %s330_s8, %s491_s4 }
  0x38   :  { %p336_p12 = pnand %p334_p11, %p331_p10 }
  0x3a   :  { %339 = shalt.err (!%p336_p12)
}
  0x3b   :  { %s340_s13 = scalar_lea.vmem %s54_s30, 256  ;;  %p345_p0 = scmp.lt.s32.totalorder %s54_s30, %s54_s30 }
  0x3c   :  { %p341_p13 = scmp.ne.s32.totalorder %s54_s30, %s340_s13  ;;  %p346_p1 = scmp.lt.s32.totalorder %s340_s13, %s340_s13 }
  0x3e   :  { %p347_p2 = por %p346_p1, %p345_p0 }
  0x40   :  { %p348_p3 = pnand %p347_p2, %p341_p13 }
  0x42   :  { %351 = shalt.err (!%p348_p3)
}
  0x43   :  { %59 = dma.hbm_to_vmem [thread:$0]  %s491_s4, 256, %s54_s30, [#allocation9], %s385_s0, %s385_s0, %s386_s21  }
  0x44   :  { %374 = dma.done.wait [#allocation3], 128  }
  0x45   :  { %375 = vsyncadd [#allocation3], 4294967168 }
  0x46   :  { %376 = dma.done.wait [#allocation6], 384  }
  0x47   :  { %377 = vsyncadd [#allocation6], 4294966912 }
  0x48   :  { %378 = dma.done.wait [#allocation9], 256  }
  0x49   :  { %379 = vsyncadd [#allocation9], 4294967040  ;;  %v388_v0 = vmov 0.0   ;;  %vm389_vm0 = vmmov 0   ;;  %v260_v1 = vld [vmem:[#allocation7] sm:$0xff]   ;;  %v261_v2 = vld [vmem:[#allocation7 + $0x8] sm:$0xff]  }
  0x4a   :  { %235 = vmatprep.subr.bf16.mxu0 %v388_v0  ;;  %239 = vmatprep.mubr.msk.bf16.mxu0 %vm389_vm0, %v388_v0  ;;  %v73_v3 = vld [vmem:[#allocation2] sm:$0xff]  ;;  %vm98_vm1 = vcmask 261120   ;;  %v263_v6 = vld [vmem:[#allocation8 + $0x8] sm:$0xff]   ;;  %s390_s15 = smov [#allocation10]  }
  0x4b   :  { %243 = vmatprep.subr.bf16.mxu1 %v388_v0  ;;  %247 = vmatprep.mubr.msk.bf16.mxu1 %vm389_vm0, %v388_v0  ;;  %v74_v4 = vpack.c.bf16 %v73_v3, %v73_v3  ;;  %v262_v5 = vld [vmem:[#allocation8] sm:$0xff]   ;;  %v142_v9 = vld [vmem:[#allocation5] sm:$0xff]  ;;  %s211_s16 = sshll.u32 %s390_s15, 4  ;;  %s212_s16 = int_to_ptr.vmem [resolvable:$true] %s211_s16 }
  0x4c   :  { %236 = vmatpush3.bf16.msra.mxu0 %v260_v1  ;;  %244 = vmatpush3.bf16.msra.mxu1 %v262_v5  ;;  %v222_v7 = vld [vmem:[%s490_s3] ss:$0 sm:$0xff]  ;;  %s352_s17 = scalar_lea.vmem %s212_s16, 128  ;;  %p357_p5 = scmp.lt.s32.totalorder %s212_s16, %s212_s16 }
  0x4d   :  { %237 = vmatprep.subr.bf16.mxu0 %v388_v0  ;;  %245 = vmatprep.subr.bf16.mxu1 %v388_v0  ;;  %p353_p4 = scmp.ne.s32.totalorder %s212_s16, %s352_s17  ;;  %p358_p6 = scmp.lt.s32.totalorder %s352_s17, %s352_s17 }
  0x4f   :  { %p359_p7 = por %p358_p6, %p357_p5 }
  0x50   :  { %238 = vmatpush3.bf16.msra.mxu0 %v261_v2  ;;  %246 = vmatpush3.bf16.msra.mxu1 %v263_v6 }
  0x51   :  { %p360_p8 = pnand %p359_p7, %p353_p4 }
  0x53   :  { %240 = vmatmul.mubr.msk.bf16.vlgmr.msra.gmra.mrb[0].mxu0 %vm98_vm1, %v74_v4 }
 0x126   :  { %v136_v8 = vpop.f32.mrb[0].mxu0 }
 0x127   :  { %v137_v10 = vadd.f32 %v222_v7, %v136_v8  ;;  %v241_v11 = vpop.f32.mrb[1].mxu0 }
 0x128   :  { %v139_v12 = vpop.f32.mrb[2].mxu0 }
 0x129   :  { %v143_v13 = vmul.f32 %v142_v9, %v137_v10  ;;  %v242_v14 = vpop.f32.mrb[3].mxu0 }
 0x12b   :  { %v144_v15 = vpack.c.bf16 %v143_v13, %v143_v13 }
 0x12d   :  { %248 = vmatmul.mubr.msk.bf16.vlgmr.msra.gmra.mrb[0].mxu1 %vm98_vm1, %v144_v15 }
 0x200   :  { %v198_v16 = vpop.f32.mrb[0].mxu1 }
 0x201   :  { %204 = vst.msk [vmem:[#allocation10] sm:$0xff] %vm98_vm1, %v198_v16  ;;  %v249_v17 = vpop.f32.mrb[1].mxu1 }
 0x202   :  { %v201_v18 = vpop.f32.mrb[2].mxu1 }
 0x203   :  { %363 = shalt.err (!%p360_p8)
}
 0x204   :  { %s364_s19 = scalar_lea.hbm %s492_s5, 128 }
 0x205   :  { %p365_p9 = scmp.ne.s32.totalorder %s492_s5, %s364_s19  ;;  %p368_p10 = scmp.lt.u32.totalorder %s364_s19, %s492_s5 }
 0x207   :  { %p370_p11 = pnand %p368_p10, %p365_p9 }
 0x209   :  { %373 = shalt.err (!%p370_p11)
}
 0x20a   :  { %214 = dma.vmem_to_hbm [thread:$0]  %s212_s16, 128, %s492_s5, [#allocation4]   ;;  %v250_v19 = vpop.f32.mrb[3].mxu1 }
 0x20b   :  { %380 = dma.done.wait [#allocation4], 128  }
 0x20c   :  { %381 = vsyncadd [#allocation4], 4294967168 }
 0x20d   :  { %218 = vsyncpa [#allocation3], 1 }
 0x20e   :  { %219 = vsyncpa [#allocation6], 1 }
 0x20f   :  { %220 = vsyncpa [#allocation9], 1 }
 0x210   :  { %221 = vsyncpa [#allocation4], 1 }

</bundles_post_ra>
